<compile_context>
chip_gen: v7x
topology: tpu7x:2x2x1
jax: 0.10.0
libtpu: 0.0.40
codegen_flags: <defaults>
</compile_context>

<pallas_src>
import functools
import math

import jax
import jax.numpy as jnp
from jax.experimental import pallas as pl
from jax.experimental.pallas import tpu as pltpu

LANE = 128      # vreg lane width  (last dim)
SUBLANE = 8     # vreg sublane width (second-to-last dim)


def _round_up(n, m):
    return (n + m - 1) // m * m


def _vmem_bytes(rows, cols, itemsize):
    """Lane/sublane-padded VMEM footprint of a 2-D slab."""
    return _round_up(rows, SUBLANE) * _round_up(cols, LANE) * itemsize


def _fused_mlp_kernel(*refs, n_layers, input_dim, output_dim):
    """One batch tile through the whole MLP. refs = (x, w1, b1, ..., wN, bN, out)."""
    x_ref, o_ref = refs[0], refs[-1]
    layer_refs = refs[1:-1]

    h = None
    for li in range(n_layers):
        w_ref = layer_refs[2 * li]          # (fan_in[_p], fan_out_p) bf16, VMEM-resident
        b_ref = layer_refs[2 * li + 1]      # (1, fan_out_p) f32
        if li == 0:
            x = x_ref[...]                  # (TB, input_dim) f32 — true width, no lane padding
            if input_dim <= SUBLANE:
                # Degenerate-K first layer: rank-1 broadcast-FMAs on the VPU,
                # skipping MXU push/pop latency and tiny-K weight relayout.
                y = b_ref[...] + x[:, 0:1] * w_ref[0:1, :].astype(jnp.float32)
                for k in range(1, input_dim):
                    y = y + x[:, k:k + 1] * w_ref[k:k + 1, :].astype(jnp.float32)
            else:
                y = jnp.dot(x.astype(jnp.bfloat16), w_ref[...],
                            preferred_element_type=jnp.float32) + b_ref[...]
        else:
            y = jnp.dot(h, w_ref[...],
                        preferred_element_type=jnp.float32) + b_ref[...]
        if li + 1 < n_layers:
            # ReLU in f32 (v5e VPU has no bf16), then carry bf16 between layers
            # to halve spill/vreg pressure of the (TB, 128) intermediate.
            h = jnp.maximum(y, 0.0).astype(jnp.bfloat16)
        else:
            # Slice to the true output width before the sigmoid (EUP) and the
            # store: narrow (TB, output_dim) writeback, dense/contiguous in HBM.
            o_ref[...] = jax.nn.sigmoid(y[:, :output_dim]).astype(o_ref.dtype)


def init_simplenet_params(key, input_dim, hidden_dim, output_dim):
    """nn.Linear-style init U(-1/sqrt(fan_in), +1/sqrt(fan_in)), stored
    transposed as (fan_in, fan_out).  fan_out is pre-padded ONCE to the
    128-lane vreg width; fan_in of layer i matches the padded fan_out of layer
    i-1 — the first layer keeps its true fan_in (= input_dim) since it runs
    the rank-1 VPU path.  Zero padding keeps forward semantics identical to
    the unpadded PyTorch module.  Weights bf16 (MXU-native), biases f32."""
    sizes = [input_dim] + list(hidden_dim) + [output_dim]
    params = []
    prev_padded = input_dim
    for fan_in, fan_out in zip(sizes[:-1], sizes[1:]):
        key, kw, kb = jax.random.split(key, 3)
        bound = 1.0 / math.sqrt(fan_in)
        w = jax.random.uniform(kw, (fan_in, fan_out), jnp.float32, -bound, bound)
        b = jax.random.uniform(kb, (1, fan_out), jnp.float32, -bound, bound)
        fo_p = _round_up(fan_out, LANE)
        w_p = jnp.zeros((prev_padded, fo_p), jnp.float32).at[:fan_in, :fan_out].set(w)
        b_p = jnp.zeros((1, fo_p), jnp.float32).at[:, :fan_out].set(b)
        params.append((w_p.astype(jnp.bfloat16), b_p))
        prev_padded = fo_p
    return params


def simplenet_forward(params, x, output_dim, *, batch_tile=2048):
    """Fused forward pass: hidden layers with ReLU, output layer with Sigmoid."""
    batch, in_dim = x.shape
    n_layers = len(params)

    # Batch tile: big enough to amortize the ~0.35 us per-grid-step overhead,
    # but chosen so the grid has >= 2 steps whenever the batch allows it
    # (lets ("parallel",) shard the batch across v7x's 2 TCs; no-op v5e/v6e).
    tb = min(batch_tile, max(SUBLANE, _round_up((batch + 1) // 2, SUBLANE)))
    b_pad = _round_up(batch, tb)

    # True-width input stream (b_pad, in_dim): ~8 B/row for the Moon MLP.
    x = x.astype(jnp.float32)
    if b_pad != batch:
        x_in = jnp.zeros((b_pad, in_dim), jnp.float32).at[:batch].set(x)
    else:
        x_in = x

    flat_params = [t for wb in params for t in wb]
    param_specs = []
    for w, b in params:
        # Constant block index every grid step -> weights/biases stay resident
        # in VMEM across batch tiles, no re-DMA.
        param_specs.append(pl.BlockSpec(w.shape, lambda i: (0, 0)))
        param_specs.append(pl.BlockSpec(b.shape, lambda i: (0, 0)))

    # Explicit VMEM budget from real lane/sublane-padded footprints:
    # double-buffered in/out streams + resident params + a few internal
    # (tb, 128) slabs.  Capped at 48 MiB (v7x has only 64 MiB physical VMEM).
    hidden_p = max(w.shape[1] for w, _ in params)
    stream_bytes = 2 * (_vmem_bytes(tb, in_dim, 4) + _vmem_bytes(tb, output_dim, 4))
    act_bytes = 3 * _vmem_bytes(tb, hidden_p, 4)
    param_bytes = 2 * sum(_vmem_bytes(*w.shape, 2) + _vmem_bytes(*b.shape, 4)
                          for w, b in params)
    vmem_limit = min(max(2 * (stream_bytes + act_bytes + param_bytes), 16 << 20),
                     48 << 20)

    kernel = functools.partial(_fused_mlp_kernel, n_layers=n_layers,
                               input_dim=in_dim, output_dim=output_dim)

    out = pl.pallas_call(
        kernel,
        out_shape=jax.ShapeDtypeStruct((b_pad, output_dim), jnp.float32),
        grid_spec=pltpu.PrefetchScalarGridSpec(
            num_scalar_prefetch=0,
            grid=(b_pad // tb,),
            in_specs=[pl.BlockSpec((tb, in_dim), lambda i: (i, 0))] + param_specs,
            out_specs=pl.BlockSpec((tb, output_dim), lambda i: (i, 0)),
        ),
        compiler_params=pltpu.CompilerParams(
            dimension_semantics=("parallel",),   # 2-TC sharding on v7x; no-op v5e/v6e
            vmem_limit_bytes=vmem_limit,
        ),
    )(x_in, *flat_params)

    # Drop any padded batch rows; columns are already the true output width.
    return out[:batch]


def simplenet_reference(params, x, output_dim):
    """Plain-JAX f32 reference with the same (padded) parameters."""
    h = x.astype(jnp.float32)
    for w, b in params[:-1]:
        h = jnp.maximum(h @ w.astype(jnp.float32) + b, 0.0)
    w, b = params[-1]
    return jax.nn.sigmoid(h @ w.astype(jnp.float32) + b)[:, :output_dim]


if __name__ == "__main__":
    # Small shapes consistent with the Moon-data MLP: 2 input features,
    # two hidden layers, single sigmoid output.
    input_dim = 2
    hidden_dim = [32, 16]
    output_dim = 1
    batch = 8

    key = jax.random.PRNGKey(0)
    key_x, key_p = jax.random.split(key)
    x = jax.random.normal(key_x, (batch, input_dim), jnp.float32)
    params = init_simplenet_params(key_p, input_dim, hidden_dim, output_dim)

    fwd = jax.jit(functools.partial(simplenet_forward, output_dim=output_dim))
    out = jax.block_until_ready(fwd(params, x))

    # Sanity: correct shape and sigmoid range.
    assert out.shape == (batch, output_dim)
    assert bool(jnp.all((out >= 0.0) & (out <= 1.0)))

    # Cross-check against plain-JAX f32 reference (bf16 weights/activations on
    # the MXU path -> loosened tolerance).
    ref = simplenet_reference(params, x, output_dim)
    assert bool(jnp.allclose(out, ref, atol=1e-2, rtol=1e-2))

    print("KERNEL_OK")
</pallas_src>

<mosaic_0001>
module attributes {stable_mosaic.version = 11 : i64} {
  func.func @_fused_mlp_kernel(%arg0: i32, %arg1: memref<8x2xf32, #tpu.memory_space<vmem>>, %arg2: memref<2x128xbf16, #tpu.memory_space<vmem>>, %arg3: memref<1x128xf32, #tpu.memory_space<vmem>>, %arg4: memref<128x128xbf16, #tpu.memory_space<vmem>>, %arg5: memref<1x128xf32, #tpu.memory_space<vmem>>, %arg6: memref<128x128xbf16, #tpu.memory_space<vmem>>, %arg7: memref<1x128xf32, #tpu.memory_space<vmem>>, %arg8: memref<8x1xf32, #tpu.memory_space<vmem>>) attributes {dimension_semantics = [#tpu.dimension_semantics<parallel>], iteration_bounds = array<i64: 1>, scalar_prefetch = 0 : i64, scratch_operands = 0 : i64, tpu.core_type = #tpu.core_type<tc>, window_params = [{transform_indices = @transform_0, window_bounds = array<i64: 8, 2>}, {pipeline_mode = #tpu.pipeline_mode<synchronous>, transform_indices = @transform_1, window_bounds = array<i64: 2, 128>}, {pipeline_mode = #tpu.pipeline_mode<synchronous>, transform_indices = @transform_2, window_bounds = array<i64: 1, 128>}, {pipeline_mode = #tpu.pipeline_mode<synchronous>, transform_indices = @transform_3, window_bounds = array<i64: 128, 128>}, {pipeline_mode = #tpu.pipeline_mode<synchronous>, transform_indices = @transform_4, window_bounds = array<i64: 1, 128>}, {pipeline_mode = #tpu.pipeline_mode<synchronous>, transform_indices = @transform_5, window_bounds = array<i64: 128, 128>}, {pipeline_mode = #tpu.pipeline_mode<synchronous>, transform_indices = @transform_6, window_bounds = array<i64: 1, 128>}, {transform_indices = @transform_7, window_bounds = array<i64: 8, 1>}]} {
    %c0 = arith.constant 0 : index
    %c0_0 = arith.constant 0 : index
    %0 = vector.load %arg1[%c0, %c0_0] : memref<8x2xf32, #tpu.memory_space<vmem>>, vector<8x2xf32>
    %c0_1 = arith.constant 0 : index
    %c0_2 = arith.constant 0 : index
    %1 = vector.load %arg3[%c0_1, %c0_2] : memref<1x128xf32, #tpu.memory_space<vmem>>, vector<1x128xf32>
    %2 = vector.extract_strided_slice %0 {offsets = [0, 0], sizes = [8, 1], strides = [1, 1]} : vector<8x2xf32> to vector<8x1xf32>
    %c0_3 = arith.constant 0 : index
    %c0_4 = arith.constant 0 : index
    %3 = vector.load %arg2[%c0_3, %c0_4] : memref<2x128xbf16, #tpu.memory_space<vmem>>, vector<1x128xbf16>
    %4 = arith.extf %3 : vector<1x128xbf16> to vector<1x128xf32>
    %5 = vector.broadcast %2 : vector<8x1xf32> to vector<8x128xf32>
    %6 = vector.broadcast %4 : vector<1x128xf32> to vector<8x128xf32>
    %7 = arith.mulf %5, %6 : vector<8x128xf32>
    %8 = vector.broadcast %1 : vector<1x128xf32> to vector<8x128xf32>
    %9 = arith.addf %8, %7 : vector<8x128xf32>
    %10 = vector.extract_strided_slice %0 {offsets = [0, 1], sizes = [8, 1], strides = [1, 1]} : vector<8x2xf32> to vector<8x1xf32>
    %c1 = arith.constant 1 : index
    %c0_5 = arith.constant 0 : index
    %11 = vector.load %arg2[%c1, %c0_5] : memref<2x128xbf16, #tpu.memory_space<vmem>>, vector<1x128xbf16>
    %12 = arith.extf %11 : vector<1x128xbf16> to vector<1x128xf32>
    %13 = vector.broadcast %10 : vector<8x1xf32> to vector<8x128xf32>
    %14 = vector.broadcast %12 : vector<1x128xf32> to vector<8x128xf32>
    %15 = arith.mulf %13, %14 : vector<8x128xf32>
    %16 = arith.addf %9, %15 : vector<8x128xf32>
    %cst = arith.constant 0.000000e+00 : f32
    %17 = vector.broadcast %cst : f32 to vector<8x128xf32>
    %18 = arith.maximumf %16, %17 : vector<8x128xf32>
    %19 = arith.truncf %18 : vector<8x128xf32> to vector<8x128xbf16>
    %c0_6 = arith.constant 0 : index
    %c0_7 = arith.constant 0 : index
    %20 = vector.load %arg4[%c0_6, %c0_7] : memref<128x128xbf16, #tpu.memory_space<vmem>>, vector<128x128xbf16>
    %cst_8 = arith.constant dense<0.000000e+00> : vector<8x128xf32>
    %21 = tpu.matmul %19, %20, %cst_8 {dimension_numbers = #tpu.dot_dimension_numbers<[1], [0], [0], [1], [0, 0, 1, 1], [], []>} : vector<8x128xbf16>, vector<128x128xbf16>, vector<8x128xf32> -> vector<8x128xf32>
    %c0_9 = arith.constant 0 : index
    %c0_10 = arith.constant 0 : index
    %22 = vector.load %arg5[%c0_9, %c0_10] : memref<1x128xf32, #tpu.memory_space<vmem>>, vector<1x128xf32>
    %23 = vector.broadcast %22 : vector<1x128xf32> to vector<8x128xf32>
    %24 = arith.addf %21, %23 : vector<8x128xf32>
    %cst_11 = arith.constant 0.000000e+00 : f32
    %25 = vector.broadcast %cst_11 : f32 to vector<8x128xf32>
    %26 = arith.maximumf %24, %25 : vector<8x128xf32>
    %27 = arith.truncf %26 : vector<8x128xf32> to vector<8x128xbf16>
    %c0_12 = arith.constant 0 : index
    %c0_13 = arith.constant 0 : index
    %28 = vector.load %arg6[%c0_12, %c0_13] : memref<128x128xbf16, #tpu.memory_space<vmem>>, vector<128x128xbf16>
    %cst_14 = arith.constant dense<0.000000e+00> : vector<8x128xf32>
    %29 = tpu.matmul %27, %28, %cst_14 {dimension_numbers = #tpu.dot_dimension_numbers<[1], [0], [0], [1], [0, 0, 1, 1], [], []>} : vector<8x128xbf16>, vector<128x128xbf16>, vector<8x128xf32> -> vector<8x128xf32>
    %c0_15 = arith.constant 0 : index
    %c0_16 = arith.constant 0 : index
    %30 = vector.load %arg7[%c0_15, %c0_16] : memref<1x128xf32, #tpu.memory_space<vmem>>, vector<1x128xf32>
    %31 = vector.broadcast %30 : vector<1x128xf32> to vector<8x128xf32>
    %32 = arith.addf %29, %31 : vector<8x128xf32>
    %33 = vector.extract_strided_slice %32 {offsets = [0, 0], sizes = [8, 1], strides = [1, 1]} : vector<8x128xf32> to vector<8x1xf32>
    %34 = arith.negf %33 : vector<8x1xf32>
    %35 = math.exp %34 : vector<8x1xf32>
    %cst_17 = arith.constant 1.000000e+00 : f32
    %36 = vector.broadcast %cst_17 : f32 to vector<8x1xf32>
    %37 = arith.addf %36, %35 : vector<8x1xf32>
    %38 = arith.divf %36, %37 : vector<8x1xf32>
    %c0_18 = arith.constant 0 : index
    %c0_19 = arith.constant 0 : index
    %39 = vector.load %arg8[%c0_18, %c0_19] : memref<8x1xf32, #tpu.memory_space<vmem>>, vector<8x1xf32>
    tpu.vector_store %arg8[%c0_18, %c0_19], %38 {strides = array<i32>} : memref<8x1xf32, #tpu.memory_space<vmem>>, vector<8x1xf32>,
    return
  }
  func.func @transform_0(%arg0: i32) -> (i32, i32) {
    %c0_i32 = arith.constant 0 : i32
    %c0_i32_0 = arith.constant 0 : i32
    return %arg0, %c0_i32 : i32, i32
  }
  func.func @transform_1(%arg0: i32) -> (i32, i32) {
    %c0_i32 = arith.constant 0 : i32
    %c0_i32_0 = arith.constant 0 : i32
    %c0_i32_1 = arith.constant 0 : i32
    return %c0_i32, %c0_i32_0 : i32, i32
  }
  func.func @transform_2(%arg0: i32) -> (i32, i32) {
    %c0_i32 = arith.constant 0 : i32
    %c0_i32_0 = arith.constant 0 : i32
    %c0_i32_1 = arith.constant 0 : i32
    return %c0_i32, %c0_i32_0 : i32, i32
  }
  func.func @transform_3(%arg0: i32) -> (i32, i32) {
    %c0_i32 = arith.constant 0 : i32
    %c0_i32_0 = arith.constant 0 : i32
    %c0_i32_1 = arith.constant 0 : i32
    return %c0_i32, %c0_i32_0 : i32, i32
  }
  func.func @transform_4(%arg0: i32) -> (i32, i32) {
    %c0_i32 = arith.constant 0 : i32
    %c0_i32_0 = arith.constant 0 : i32
    %c0_i32_1 = arith.constant 0 : i32
    return %c0_i32, %c0_i32_0 : i32, i32
  }
  func.func @transform_5(%arg0: i32) -> (i32, i32) {
    %c0_i32 = arith.constant 0 : i32
    %c0_i32_0 = arith.constant 0 : i32
    %c0_i32_1 = arith.constant 0 : i32
    return %c0_i32, %c0_i32_0 : i32, i32
  }
  func.func @transform_6(%arg0: i32) -> (i32, i32) {
    %c0_i32 = arith.constant 0 : i32
    %c0_i32_0 = arith.constant 0 : i32
    %c0_i32_1 = arith.constant 0 : i32
    return %c0_i32, %c0_i32_0 : i32, i32
  }
  func.func @transform_7(%arg0: i32) -> (i32, i32) {
    %c0_i32 = arith.constant 0 : i32
    %c0_i32_0 = arith.constant 0 : i32
    return %arg0, %c0_i32 : i32, i32
  }
}

</mosaic_0001>

<bundles_post_ra>
// kernel: simplenet_forward.1
= control target key start
LH: loop header
LB: loop body
LE: loop exit
PB: predicated region body
PF: predicated region fallthrough
CT: control target
= control target key end

     0   :  { %12 = vsyncpa [#allocation3], 0  ;;  %s590_s0 = inlined_call_operand.vmem [shape: f32[8,2], index: 0, kind: input, shape index: {}]   ;;  %s591_s1 = inlined_call_operand.vmem [shape: bf16[2,128], index: 1, kind: input, shape index: {}]   ;;  %s592_s2 = inlined_call_operand.vmem [shape: f32[1,128], index: 2, kind: input, shape index: {}]   ;;  %s593_s3 = inlined_call_operand.hbm [shape: bf16[128,128], index: 3, kind: input, shape index: {}]   ;;  %s594_s4 = inlined_call_operand.vmem [shape: f32[1,128], index: 4, kind: input, shape index: {}]   ;;  %s595_s5 = inlined_call_operand.hbm [shape: bf16[128,128], index: 5, kind: input, shape index: {}]   ;;  %s596_s6 = inlined_call_operand.vmem [shape: f32[1,128], index: 6, kind: input, shape index: {}]   ;;  %s597_s7 = inlined_call_operand.vmem [shape: f32[8,1], index: 7, kind: output, shape index: {}]  }
   0x1   :  { %13 = vsyncpa [#allocation5], 0  ;;  %s482_s24 = smov [#allocation2]   ;;  %s434_s28 = scalar_lea.hbm %s593_s3, 1024 }
   0x2   :  { %s25_s25 = sshll.u32 %s482_s24, 4  ;;  %p435_p0 = scmp.ne.s32.totalorder %s593_s3, %s434_s28  ;;  %s26_s25 = int_to_ptr.vmem [resolvable:$true] %s25_s25 }
   0x3   :  { %p438_p1 = scmp.lt.u32.totalorder %s434_s28, %s593_s3 }
   0x5   :  { %p440_p2 = pnand %p438_p1, %p435_p0 }
   0x7   :  { %443 = shalt.err (!%p440_p2)
}
   0x8   :  { %s444_s10 = scalar_lea.vmem %s26_s25, 1024  ;;  %p449_p4 = scmp.lt.s32.totalorder %s26_s25, %s26_s25 }
   0x9   :  { %p445_p3 = scmp.ne.s32.totalorder %s26_s25, %s444_s10  ;;  %p450_p5 = scmp.lt.s32.totalorder %s444_s10, %s444_s10 }
   0xb   :  { %p451_p6 = por %p450_p5, %p449_p4 }
   0xd   :  { %p452_p7 = pnand %p451_p6, %p445_p3 }
   0xf   :  { %455 = shalt.err (!%p452_p7)
}
  0x10   :  { %s483_s11 = smov 64   ;;  %s484_s12 = smov 4  }
  0x11   :  { %31 = dma.hbm_to_vmem [thread:$0]  %s593_s3, 1024, %s26_s25, [#allocation3], %s483_s11, %s483_s11, %s484_s12  }
  0x12   :  { %s485_s15 = smov [#allocation4]   ;;  %s456_s19 = scalar_lea.hbm %s595_s5, 1024 }
  0x13   :  { %s39_s16 = sshll.u32 %s485_s15, 4  ;;  %p457_p8 = scmp.ne.s32.totalorder %s595_s5, %s456_s19  ;;  %s40_s16 = int_to_ptr.vmem [resolvable:$true] %s39_s16 }
  0x14   :  { %p460_p9 = scmp.lt.u32.totalorder %s456_s19, %s595_s5 }
  0x16   :  { %p462_p10 = pnand %p460_p9, %p457_p8 }
  0x18   :  { %465 = shalt.err (!%p462_p10)
}
  0x19   :  { %s466_s24 = scalar_lea.vmem %s40_s16, 1024  ;;  %p471_p12 = scmp.lt.s32.totalorder %s40_s16, %s40_s16 }
  0x1a   :  { %p467_p11 = scmp.ne.s32.totalorder %s40_s16, %s466_s24  ;;  %p472_p13 = scmp.lt.s32.totalorder %s466_s24, %s466_s24 }
  0x1c   :  { %p473_p0 = por %p472_p13, %p471_p12 }
  0x1e   :  { %p474_p1 = pnand %p473_p0, %p467_p11 }
  0x20   :  { %477 = shalt.err (!%p474_p1)
}
  0x21   :  { %45 = dma.hbm_to_vmem [thread:$0]  %s595_s5, 1024, %s40_s16, [#allocation5], %s483_s11, %s483_s11, %s484_s12  }
  0x22   :  { %478 = dma.done.wait [#allocation3], 1024  }
  0x23   :  { %479 = vsyncadd [#allocation3], 4294966272 }
  0x24   :  { %480 = dma.done.wait [#allocation5], 1024  }
  0x25   :  { %481 = vsyncadd [#allocation5], 4294966272  ;;  %v486_v0 = vmov 0   ;;  %v487_v1 = vmov 0.0   ;;  %v55_v2 = vld [vmem:[%s590_s0] sm:$0xff]  ;;  %v415_v4 = vld [vmem:[#allocation2 + $0x8] sm:$0xff]   ;;  %v64_v18 = vlaneseq }
  0x26   :  { %412 = vset.pattern.permute.xlu0 %v486_v0  ;;  %364 = vmatprep.subr.bf16.mxu0 %v487_v1  ;;  %v414_v3 = vld [vmem:[#allocation2] sm:$0xff]   ;;  %v488_v5 = vmov 1   ;;  %v416_v6 = vld [vmem:[#allocation2 + $0x10] sm:$0xff]   ;;  %v417_v7 = vld [vmem:[#allocation2 + $0x18] sm:$0xff]   ;;  %vm489_vm0 = vmmov 0   ;;  %vm318_vm1 = vcmask 7168  }
  0x27   :  { %384 = vmatprep.subr.bf16.mxu1 %v487_v1  ;;  %61 = vperm.xlu0 %412, %v55_v2   ;;  %v422_v8 = vld [vmem:[#allocation4] sm:$0xff]   ;;  %v423_v10 = vld [vmem:[#allocation4 + $0x8] sm:$0xff]   ;;  %v424_v12 = vld [vmem:[#allocation4 + $0x10] sm:$0xff]   ;;  %v65_v19 = vshrl.u32 %v64_v18, 7 }
  0x28   :  { %365 = vmatpush3.bf16.msra.mxu0 %v414_v3  ;;  %380 = vmatprep.mubr.msk.bf16.mxu0 %vm489_vm0, %v487_v1  ;;  %v418_v9 = vld [vmem:[#allocation2 + $0x20] sm:$0xff]   ;;  %v419_v11 = vld [vmem:[#allocation2 + $0x28] sm:$0xff]   ;;  %v420_v13 = vld [vmem:[#allocation2 + $0x30] sm:$0xff]  }
  0x29   :  { %366 = vmatprep.subr.bf16.mxu0 %v487_v1  ;;  %400 = vmatprep.mubr.msk.bf16.mxu1 %vm489_vm0, %v487_v1  ;;  %v425_v14 = vld [vmem:[#allocation4 + $0x18] sm:$0xff]   ;;  %v426_v16 = vld [vmem:[#allocation4 + $0x20] sm:$0xff]   ;;  %v427_v17 = vld [vmem:[#allocation4 + $0x28] sm:$0xff]   ;;  %v66_v22 = vsub.s32 0, %v65_v19  ;;  %v82_v24 = vsub.s32 1, %v65_v19 }
  0x2a   :  { %385 = vmatpush3.bf16.msra.mxu1 %v422_v8  ;;  %v421_v15 = vld [vmem:[#allocation2 + $0x38] sm:$0xff]   ;;  %v57_v20 = vld [vmem:[%s591_s1] sm:$0x1]  ;;  %v428_v35 = vld [vmem:[#allocation4 + $0x30] sm:$0xff]  }
  0x2b   :  { %413 = vset.pattern.permute.xlu0 %v488_v5  ;;  %386 = vmatprep.subr.bf16.mxu1 %v487_v1  ;;  %v58_v21 = vunpack.c.l.bf16 %v57_v20  ;;  %v326_v28 = vld [vmem:[%s592_s2] ss:$0 sm:$0xff]  ;;  %v429_v36 = vld [vmem:[#allocation4 + $0x38] sm:$0xff]  }
  0x2c   :  { %77 = vperm.xlu0 %413, %v55_v2   ;;  %367 = vmatpush3.bf16.msra.mxu0 %v415_v4  ;;  %v327_v37 = vld [vmem:[%s594_s4] ss:$0 sm:$0xff] }
  0x2d   :  { %368 = vmatprep.subr.bf16.mxu0 %v487_v1  ;;  %v67_v23 = vrot.slane %v58_v21, %v66_v22  ;;  %v83_v27 = vrot.slane %v58_v21, %v82_v24  ;;  %v336_v45 = vld [vmem:[%s596_s6] ss:$0 sm:$0xff] }
  0x2e   :  { %387 = vmatpush3.bf16.msra.mxu1 %v423_v10 }
  0x2f   :  { %388 = vmatprep.subr.bf16.mxu1 %v487_v1 }
  0x30   :  { %369 = vmatpush3.bf16.msra.mxu0 %v416_v6 }
  0x31   :  { %370 = vmatprep.subr.bf16.mxu0 %v487_v1 }
  0x32   :  { %389 = vmatpush3.bf16.msra.mxu1 %v424_v12 }
  0x33   :  { %390 = vmatprep.subr.bf16.mxu1 %v487_v1 }
  0x34   :  { %371 = vmatpush3.bf16.msra.mxu0 %v417_v7 }
  0x35   :  { %372 = vmatprep.subr.bf16.mxu0 %v487_v1 }
  0x36   :  { %391 = vmatpush3.bf16.msra.mxu1 %v425_v14 }
  0x37   :  { %392 = vmatprep.subr.bf16.mxu1 %v487_v1 }
  0x38   :  { %373 = vmatpush3.bf16.msra.mxu0 %v418_v9 }
  0x39   :  { %374 = vmatprep.subr.bf16.mxu0 %v487_v1 }
  0x3a   :  { %393 = vmatpush3.bf16.msra.mxu1 %v426_v16 }
  0x3b   :  { %394 = vmatprep.subr.bf16.mxu1 %v487_v1 }
  0x3c   :  { %375 = vmatpush3.bf16.msra.mxu0 %v419_v11 }
  0x3d   :  { %376 = vmatprep.subr.bf16.mxu0 %v487_v1 }
  0x3e   :  { %395 = vmatpush3.bf16.msra.mxu1 %v427_v17 }
  0x3f   :  { %396 = vmatprep.subr.bf16.mxu1 %v487_v1 }
  0x40   :  { %377 = vmatpush3.bf16.msra.mxu0 %v420_v13 }
  0x41   :  { %378 = vmatprep.subr.bf16.mxu0 %v487_v1 }
  0x42   :  { %397 = vmatpush3.bf16.msra.mxu1 %v428_v35 }
  0x43   :  { %398 = vmatprep.subr.bf16.mxu1 %v487_v1 }
  0x44   :  { %379 = vmatpush3.bf16.msra.mxu0 %v421_v15 }
  0x46   :  { %399 = vmatpush3.bf16.msra.mxu1 %v429_v36 }
  0xa6   :  { %v62_v25 = vpop.permute.xlu0 %61 }
  0xa7   :  { %v68_v26 = vmul.f32 %v67_v23, %v62_v25 }
  0xa9   :  { %v75_v30 = vadd.f32 %v326_v28, %v68_v26 }
  0xab   :  { %v78_v29 = vpop.permute.xlu0 %77 }
  0xac   :  { %v84_v31 = vmul.f32 %v83_v27, %v78_v29 }
  0xae   :  { %v85_v32 = vadd.f32 %v84_v31, %v75_v30 }
  0xb0   :  { %v86_v33 = vmax.f32 %v85_v32, 0.0 }
  0xb2   :  { %v87_v34 = vpack.c.bf16 %v86_v33, %v86_v33 }
  0xb4   :  { %381 = vmatmul.mubr.bf16.vlgmr.msra.gmra.mrb[0].mxu0 %v87_v34 }
 0x187   :  { %v193_v38 = vpop.f32.mrb[0].mxu0 }
 0x188   :  { %v194_v39 = vadd.f32 %v327_v37, %v193_v38  ;;  %v382_v40 = vpop.f32.mrb[1].mxu0 }
 0x189   :  { %v196_v41 = vpop.f32.mrb[2].mxu0 }
 0x18a   :  { %v199_v42 = vmax.f32 %v194_v39, 0.0  ;;  %v383_v43 = vpop.f32.mrb[3].mxu0 }
 0x18c   :  { %v200_v44 = vpack.c.bf16 %v199_v42, %v199_v42 }
 0x18e   :  { %401 = vmatmul.mubr.bf16.vlgmr.msra.gmra.mrb[0].mxu1 %v200_v44 }
 0x261   :  { %v306_v46 = vpop.f32.mrb[0].mxu1 }
 0x262   :  { %v307_v47 = vadd.f32 %v336_v45, %v306_v46  ;;  %v402_v48 = vpop.f32.mrb[1].mxu1 }
 0x263   :  { %v309_v49 = vpop.f32.mrb[2].mxu1 }
 0x264   :  { %v345_v50 = vmul.f32 -1.442695, %v307_v47  ;;  %v403_v51 = vpop.f32.mrb[3].mxu1 }
 0x266   :  { %430 = vpow2.f32 %v345_v50 }
 0x270   :  { %v431_v52 = vpop.eup %430 }
 0x271   :  { %v315_v53 = vadd.f32 1.0, %v431_v52 }
 0x273   :  { %432 = vrcp.f32 %v315_v53 }
 0x27d   :  { %v433_v54 = vpop.eup %432 }
 0x27e   :  { %319 = vst.msk [vmem:[%s597_s7] sm:$0xff] %vm318_vm1, %v433_v54 }
 0x27f   :  { %324 = vsyncpa [#allocation3], 1 }
 0x280   :  { %325 = vsyncpa [#allocation5], 1 }

</bundles_post_ra>
